<compile_context>
chip_gen: v7x
topology: tpu7x:2x2x1
jax: 0.10.0
libtpu: 0.0.40
codegen_flags: <defaults>
</compile_context>

<pallas_src>
import functools

import jax
import jax.numpy as jnp
from jax.experimental import pallas as pl
from jax.experimental.pallas import tpu as pltpu

_LANE = 128
_SUBLANE = 8
_MAX_TILE_ROWS = 1024   # 1024 x 128 x 4 B = 512 KiB per buffer.


def _softplus(x):
    # Match torch.nn.functional.softplus (beta=1, threshold=20):
    # returns x for x > 20, log(1 + exp(x)) otherwise.
    safe = jnp.minimum(x, 20.0)
    return jnp.where(x > 20.0, x, jnp.log1p(jnp.exp(safe)))


def _splitdim_kernel(x_ref, spv_ref, o_ref, *, col, d, tile_rows):
    # x_ref: (tile_rows, 128) lane-dense slab of the row-major flattened input.
    x = x_ref[...]
    row = jax.lax.broadcasted_iota(jnp.int32, x.shape, 0)
    lane = jax.lax.broadcasted_iota(jnp.int32, x.shape, 1)
    flat = (pl.program_id(0) * tile_rows + row) * _LANE + lane
    is_col = (flat % d) == col
    sp = _softplus(x) + spv_ref[0, 0]           # spv = softplus(var) from SMEM
    o_ref[...] = jnp.where(is_col, sp, x)


def split_dim(x, var, col=1):
    """x: [N, D], var: [1] learnable scalar.  Returns [N, D]."""
    # TODO(synk): `col` is a static Python int (as in the nn.Module); a traced
    # column index would have to be passed through SMEM instead.
    n, d = x.shape
    total = n * d

    # softplus(var): one scalar op, done once outside the kernel.
    spv = _softplus(var.astype(x.dtype).reshape(())).reshape(1, 1)

    # Row-major flatten + pad so the slab is (rows, 128) with rows % 8 == 0.
    pad_unit = _LANE * _SUBLANE
    padded = ((total + pad_unit - 1) // pad_unit) * pad_unit
    flat = x.reshape(-1)
    if padded != total:
        flat = jnp.pad(flat, (0, padded - total))
    rows = padded // _LANE
    slab = flat.reshape(rows, _LANE)

    tile_rows = min(_MAX_TILE_ROWS, rows)       # multiple of 8 either way
    grid = (pl.cdiv(rows, tile_rows),)

    kernel = functools.partial(_splitdim_kernel, col=col, d=d, tile_rows=tile_rows)
    out = pl.pallas_call(
        kernel,
        out_shape=jax.ShapeDtypeStruct((rows, _LANE), x.dtype),
        grid=grid,
        in_specs=[
            pl.BlockSpec((tile_rows, _LANE), lambda i: (i, 0)),          # x slab
            pl.BlockSpec(memory_space=pltpu.MemorySpace.SMEM),           # softplus(var)
        ],
        out_specs=pl.BlockSpec((tile_rows, _LANE), lambda i: (i, 0)),
        compiler_params=pltpu.CompilerParams(
            dimension_semantics=("parallel",)),
        input_output_aliases={0: 0},
    )(slab, spv)

    return out.reshape(-1)[:total].reshape(n, d)


def split_dim_ref(x, var, col=1):
    # Pure-JAX reference mirroring the PyTorch forward.
    t = _softplus(x[:, col]) + _softplus(var[0])
    return jnp.concatenate(
        [x[:, :col], t.reshape(-1, 1), x[:, col + 1:]], axis=1
    )


if __name__ == "__main__":
    key = jax.random.PRNGKey(0)

    # Module-scale test (regression net: tiny feature dim).
    n, d = 8, 4
    x = jax.random.normal(key, (n, d), dtype=jnp.float32)
    var = jnp.zeros((1,), dtype=jnp.float32)   # nn.Parameter(torch.zeros(1))

    out = jax.block_until_ready(split_dim(x, var, col=1))
    ref = split_dim_ref(x, var, col=1)
    assert out.shape == (n, d)
    assert jnp.allclose(out, ref, atol=1e-5, rtol=1e-5)

    # Larger test: exercises multiple grid steps, padded tail, non-pow2 D,
    # and the softplus threshold branch.
    n2, d2 = 37000, 5
    x2 = jax.random.normal(jax.random.PRNGKey(1), (n2, d2), dtype=jnp.float32) * 10.0
    var2 = jnp.array([0.3], dtype=jnp.float32)
    out2 = jax.block_until_ready(split_dim(x2, var2, col=1))
    ref2 = split_dim_ref(x2, var2, col=1)
    assert out2.shape == (n2, d2)
    assert jnp.allclose(out2, ref2, atol=1e-5, rtol=1e-5)

    print("KERNEL_OK")
</pallas_src>

<mosaic_0001>
module attributes {stable_mosaic.version = 11 : i64} {
  func.func @_splitdim_kernel(%arg0: i32, %arg1: memref<8x128xf32, #tpu.memory_space<vmem>>, %arg2: memref<1x1xf32, #tpu.memory_space<smem>>, %arg3: memref<8x128xf32, #tpu.memory_space<vmem>>) attributes {dimension_semantics = [#tpu.dimension_semantics<parallel>], iteration_bounds = array<i64: 1>, scalar_prefetch = 0 : i64, scratch_operands = 0 : i64, tpu.core_type = #tpu.core_type<tc>, window_params = [{transform_indices = @transform_0, window_bounds = array<i64: 8, 128>}, {transform_indices = @transform_1, window_bounds = array<i64: 1, 1>}, {transform_indices = @transform_2, window_bounds = array<i64: 8, 128>}]} {
    %c0 = arith.constant 0 : index
    %c0_0 = arith.constant 0 : index
    %0 = vector.load %arg1[%c0, %c0_0] : memref<8x128xf32, #tpu.memory_space<vmem>>, vector<8x128xf32>
    %1 = tpu.iota {dimensions = array<i32: 0>} : vector<8x128xi32>
    %2 = tpu.iota {dimensions = array<i32: 1>} : vector<8x128xi32>
    %c8_i32 = arith.constant 8 : i32
    %3 = arith.muli %arg0, %c8_i32 : i32
    %4 = vector.broadcast %3 : i32 to vector<8x128xi32>
    %5 = arith.addi %4, %1 : vector<8x128xi32>
    %c128_i32 = arith.constant 128 : i32
    %6 = vector.broadcast %c128_i32 : i32 to vector<8x128xi32>
    %7 = arith.muli %5, %6 : vector<8x128xi32>
    %8 = arith.addi %7, %2 : vector<8x128xi32>
    %c4_i32 = arith.constant 4 : i32
    %c0_i32 = arith.constant 0 : i32
    %9 = arith.cmpi eq, %c4_i32, %c0_i32 : i32
    %c1_i32 = arith.constant 1 : i32
    %10 = arith.select %9, %c1_i32, %c4_i32 : i32
    %11 = vector.broadcast %10 : i32 to vector<8x128xi32>
    %12 = arith.remsi %8, %11 : vector<8x128xi32>
    %c0_i32_1 = arith.constant 0 : i32
    %13 = vector.broadcast %c0_i32_1 : i32 to vector<8x128xi32>
    %14 = arith.cmpi ne, %12, %13 : vector<8x128xi32>
    %c0_i32_2 = arith.constant 0 : i32
    %15 = vector.broadcast %c0_i32_2 : i32 to vector<8x128xi32>
    %16 = arith.cmpi slt, %12, %15 : vector<8x128xi32>
    %c0_i32_3 = arith.constant 0 : i32
    %17 = arith.cmpi slt, %10, %c0_i32_3 : i32
    %18 = vector.broadcast %17 : i1 to vector<8x128xi1>
    %19 = vector.broadcast %18 : vector<8x128xi1> to vector<8x128xi1>
    %20 = arith.xori %16, %19 : vector<8x128xi1>
    %21 = arith.andi %20, %14 : vector<8x128xi1>
    %22 = vector.broadcast %10 : i32 to vector<8x128xi32>
    %23 = arith.addi %12, %22 : vector<8x128xi32>
    %24 = arith.select %21, %23, %12 : vector<8x128xi1>, vector<8x128xi32>
    %c1_i32_4 = arith.constant 1 : i32
    %25 = vector.broadcast %c1_i32_4 : i32 to vector<8x128xi32>
    %26 = arith.cmpi eq, %24, %25 : vector<8x128xi32>
    %cst = arith.constant 2.000000e+01 : f32
    %27 = vector.broadcast %cst : f32 to vector<8x128xf32>
    %28 = arith.minimumf %0, %27 : vector<8x128xf32>
    %cst_5 = arith.constant 2.000000e+01 : f32
    %29 = vector.broadcast %cst_5 : f32 to vector<8x128xf32>
    %30 = arith.cmpf ogt, %0, %29 : vector<8x128xf32>
    %31 = math.exp %28 : vector<8x128xf32>
    %32 = math.log1p %31 : vector<8x128xf32>
    %33 = arith.select %30, %0, %32 : vector<8x128xi1>, vector<8x128xf32>
    %c0_6 = arith.constant 0 : index
    %c0_7 = arith.constant 0 : index
    %34 = memref.load %arg2[%c0_6, %c0_7] : memref<1x1xf32, #tpu.memory_space<smem>>
    %35 = vector.broadcast %34 : f32 to vector<8x128xf32>
    %36 = arith.addf %33, %35 : vector<8x128xf32>
    %37 = arith.select %26, %36, %0 : vector<8x128xi1>, vector<8x128xf32>
    %c0_8 = arith.constant 0 : index
    %c0_9 = arith.constant 0 : index
    %38 = vector.load %arg3[%c0_8, %c0_9] : memref<8x128xf32, #tpu.memory_space<vmem>>, vector<8x128xf32>
    tpu.vector_store %arg3[%c0_8, %c0_9], %37 {strides = array<i32>} : memref<8x128xf32, #tpu.memory_space<vmem>>, vector<8x128xf32>,
    return
  }
  func.func @transform_0(%arg0: i32) -> (i32, i32) {
    %c0_i32 = arith.constant 0 : i32
    %c0_i32_0 = arith.constant 0 : i32
    return %arg0, %c0_i32 : i32, i32
  }
  func.func @transform_1(%arg0: i32) -> (i32, i32) {
    %c0_i32 = arith.constant 0 : i32
    %c0_i32_0 = arith.constant 0 : i32
    %c0_i32_1 = arith.constant 0 : i32
    return %c0_i32, %c0_i32_0 : i32, i32
  }
  func.func @transform_2(%arg0: i32) -> (i32, i32) {
    %c0_i32 = arith.constant 0 : i32
    %c0_i32_0 = arith.constant 0 : i32
    return %arg0, %c0_i32 : i32, i32
  }
}

</mosaic_0001>

<bundles_post_ra>
// kernel: tpu_custom_call.1
= control target key start
LH: loop header
LB: loop body
LE: loop exit
PB: predicated region body
PF: predicated region fallthrough
CT: control target
= control target key end

     0   :  { %8 = vsyncpa [#allocation4], 0  ;;  %s181_s0 = inlined_call_operand.hbm [shape: f32[8,128], index: 0, kind: input, shape index: {}, may-alias: {0,2}]   ;;  %s182_s1 = inlined_call_operand.<no memory space> [shape: f32[1,1], index: 1, kind: input, shape index: {}]   ;;  %s183_s2 = inlined_call_operand.hbm [shape: f32[8,128], index: 2, kind: output, shape index: {}, may-alias: {0,2}]  }
   0x1   :  { %9 = vsyncpa [#allocation5], 0  ;;  %s137_s9 = smov [#allocation3]   ;;  %s89_s13 = scalar_lea.hbm %s181_s0, 128 }
   0x2   :  { %s16_s10 = sshll.u32 %s137_s9, 4  ;;  %p90_p0 = scmp.ne.s32.totalorder %s181_s0, %s89_s13  ;;  %s17_s10 = int_to_ptr.vmem [resolvable:$true] %s16_s10 }
   0x3   :  { %p93_p1 = scmp.lt.u32.totalorder %s89_s13, %s181_s0 }
   0x5   :  { %p95_p2 = pnand %p93_p1, %p90_p0 }
   0x7   :  { %98 = shalt.err (!%p95_p2)
}
   0x8   :  { %s99_s18 = scalar_lea.vmem %s17_s10, 128  ;;  %p104_p4 = scmp.lt.s32.totalorder %s17_s10, %s17_s10 }
   0x9   :  { %p100_p3 = scmp.ne.s32.totalorder %s17_s10, %s99_s18  ;;  %p105_p5 = scmp.lt.s32.totalorder %s99_s18, %s99_s18 }
   0xb   :  { %p106_p6 = por %p105_p5, %p104_p4 }
   0xd   :  { %p107_p7 = pnand %p106_p6, %p100_p3 }
   0xf   :  { %110 = shalt.err (!%p107_p7)
}
  0x10   :  { %19 = dma.hbm_to_vmem [thread:$0]  %s181_s0, 128, %s17_s10, [#allocation4]  }
  0x11   :  { %133 = dma.done.wait [#allocation4], 128  }
  0x12   :  { %134 = vsyncadd [#allocation4], 4294967168  ;;  %v26_v0 = vlaneseq  ;;  %v25_v4 = vld [vmem:[#allocation3] sm:$0xff]  ;;  %v63_v23 = vstv %s182_s1  ;;  %s138_s22 = smov [#allocation6]  }
  0x13   :  { %v48_v6 = vmin.f32 %v25_v4, 20.0  ;;  %vm49_vm5 = vcmp.gt.f32.partialorder %v25_v4, 20.0  ;;  %s73_s23 = sshll.u32 %s138_s22, 4  ;;  %s74_s23 = int_to_ptr.vmem [resolvable:$true] %s73_s23 }
  0x14   :  { %v27_v1 = vshrl.u32 %v26_v0, 7  ;;  %v29_v2 = vand.u32 127, %v26_v0  ;;  %s111_s24 = scalar_lea.vmem %s74_s23, 128  ;;  %p116_p9 = scmp.lt.s32.totalorder %s74_s23, %s74_s23 }
  0x15   :  { %v50_v7 = vmul.f32 1.442695, %v48_v6  ;;  %p112_p8 = scmp.ne.s32.totalorder %s74_s23, %s111_s24  ;;  %p117_p10 = scmp.lt.s32.totalorder %s111_s24, %s111_s24 }
  0x16   :  { %v33_v3 = vmul.u32 128, %v27_v1 }
  0x17   :  { %85 = vpow2.f32 %v50_v7  ;;  %p118_p11 = por %p117_p10, %p116_p9 }
  0x18   :  { %v34_v5 = vadd.s32 %v33_v3, %v29_v2 }
  0x19   :  { %p119_p12 = pnand %p118_p11, %p112_p8 }
  0x1a   :  { %v36_v8 = vsub.s32 0, %v34_v5  ;;  %vm35_vm0 = vcmp.lt.s32.totalorder %v34_v5, 0 }
  0x1c   :  { %v82_v9 = vmin.u32 %v36_v8, %v34_v5 }
  0x1e   :  { %v39_v10 = vand.u32 3, %v82_v9 }
  0x20   :  { %v40_v12 = vsub.s32 0, %v39_v10 }
  0x21   :  { %v86_v11 = vpop.eup %85 }
  0x22   :  { %v52_v13 = vadd.f32 1.0, %v86_v11  ;;  %v55_v14 = vmul.f32 -0.5, %v86_v11  ;;  %v41_v15 = vsel %vm35_vm0, %v40_v12, %v39_v10  ;;  %v58_v17 = vand.u32 2147483647, %v86_v11 }
  0x23   :  { %vm42_vm1 = vcmp.ne.s32.totalorder %v41_v15, 0  ;;  %vm43_vm2 = vcmp.lt.s32.totalorder %v41_v15, 0  ;;  %v45_v18 = vadd.s32 4, %v41_v15 }
  0x24   :  { %87 = vlog2.f32 %v52_v13  ;;  %v56_v16 = vadd.f32 1.0, %v55_v14  ;;  %vm44_vm3 = vmand %vm43_vm2, %vm42_vm1  ;;  %vm59_vm4 = vcmp.lt.f32.partialorder %v58_v17, 0.0004427343 }
  0x25   :  { %v46_v21 = vsel %vm44_vm3, %v45_v18, %v41_v15 }
  0x26   :  { %v57_v19 = vmul.f32 %v86_v11, %v56_v16  ;;  %vm47_vm6 = vcmp.eq.s32.totalorder %v46_v21, 1 }
  0x2e   :  { %v88_v20 = vpop.eup %87 }
  0x2f   :  { %v54_v22 = vmul.f32 0.6931472, %v88_v20 }
  0x31   :  { %v60_v24 = vsel %vm59_vm4, %v57_v19, %v54_v22 }
  0x32   :  { %v61_v25 = vsel %vm49_vm5, %v25_v4, %v60_v24 }
  0x33   :  { %v64_v26 = vadd.f32 %v63_v23, %v61_v25 }
  0x35   :  { %v65_v27 = vsel %vm47_vm6, %v64_v26, %v25_v4 }
  0x36   :  { %66 = vst [vmem:[#allocation6] sm:$0xff] %v65_v27 }
  0x37   :  { %122 = shalt.err (!%p119_p12)
}
  0x38   :  { %s123_s1 = scalar_lea.hbm %s183_s2, 128 }
  0x39   :  { %p124_p13 = scmp.ne.s32.totalorder %s183_s2, %s123_s1  ;;  %p127_p0 = scmp.lt.u32.totalorder %s123_s1, %s183_s2 }
  0x3b   :  { %p129_p1 = pnand %p127_p0, %p124_p13 }
  0x3d   :  { %132 = shalt.err (!%p129_p1)
}
  0x3e   :  { %76 = dma.vmem_to_hbm [thread:$0]  %s74_s23, 128, %s183_s2, [#allocation5]  }
  0x3f   :  { %135 = dma.done.wait [#allocation5], 128  }
  0x40   :  { %136 = vsyncadd [#allocation5], 4294967168 }
  0x41   :  { %80 = vsyncpa [#allocation4], 1 }
  0x42   :  { %81 = vsyncpa [#allocation5], 1 }

</bundles_post_ra>
